<compile_context>
chip_gen: v5e
topology: v5e:2x2
jax: 0.10.0
libtpu: 0.0.40
codegen_flags: <defaults>
</compile_context>

<pallas_src>
import functools

import jax
import jax.numpy as jnp
from jax.experimental import pallas as pl
from jax.experimental.pallas import tpu as pltpu


_SUPPORTED_ACTS = ("Tanh", "ReLU", "Identity")


def _round_up(x: int, m: int) -> int:
    return ((x + m - 1) // m) * m


def _apply_act(y, act: str):
    if act == "Tanh":
        return jnp.tanh(y)
    if act == "ReLU":
        return jnp.maximum(y, 0.0)
    if act == "Identity":
        return y
    raise ValueError(f"unsupported activation: {act}")


def _mlp_fused_kernel(*refs, num_layers: int, activation: str, out_activation: str):
    """Fused MLP forward for one batch tile.

    refs layout:
      refs[0]                      x_ref  (TM, D0p)        f32 activations tile
      refs[1 : 1+L]                w_refs (Dinp_l, Doutp_l) bf16 per-layer weights
      refs[1+L : 1+2L]             b_refs (1, Doutp_l)      f32 per-layer biases
      refs[1+2L]                   o_ref  (TM, DLp)         f32 output tile
    """
    x_ref = refs[0]
    w_refs = refs[1:1 + num_layers]
    b_refs = refs[1 + num_layers:1 + 2 * num_layers]
    o_ref = refs[1 + 2 * num_layers]

    h = x_ref[...]                                   # f32 (TM, D0p)
    for l in range(num_layers):                      # static unroll; L small & fixed
        act = out_activation if l == num_layers - 1 else activation
        # bf16 operands into the MXU, f32 accumulation; bias add / activation in f32.
        y = jnp.dot(h.astype(jnp.bfloat16), w_refs[l][...],
                    preferred_element_type=jnp.float32) + b_refs[l][...]
        h = _apply_act(y, act)
    o_ref[...] = h.astype(o_ref.dtype)


def _resident_spec(shape):
    """Whole-array block with a constant index_map (resident across the grid).

    Single-buffered: the block index never changes, so double-buffering would only
    double its VMEM footprint.  Falls back to a plain constant block if this JAX
    version lacks pipeline_mode/Buffered.
    """
    idx_map = lambda i: (0,) * len(shape)
    try:
        return pl.BlockSpec(shape, idx_map, pipeline_mode=pl.Buffered(1))
    except Exception:
        return pl.BlockSpec(shape, idx_map)


def _choose_tm(M: int, per_row_bytes: int, resident_bytes: int) -> int:
    if M <= 128:
        tm = max(8, _round_up(M, 8))          # one tile
    elif M <= 1024:
        tm = 128                              # a few tiles -> megacore sharding (v7x)
    else:
        tm = 512                              # big tiles -> fewer grid steps, ~85% roofline
    # VMEM budget guard (conservative for v7x's 32 MiB scoped default).
    budget = 24 * 1024 * 1024
    avail = max(budget - resident_bytes, 2 * 1024 * 1024)
    cap = max(8, (avail // max(per_row_bytes, 1)) // 8 * 8)
    return max(8, min(tm, cap))


def _mlp_pallas_forward(x, *wb, activation: str, out_activation: str,
                        dims: tuple, padded_dims: tuple):
    """Pad (minimally) -> single fused pallas_call over batch tiles -> slice."""
    num_layers = len(dims) - 1
    w_list = wb[:num_layers]
    b_list = wb[num_layers:]

    in_dim, out_dim = dims[0], dims[-1]
    d0p, dlp = padded_dims[0], padded_dims[-1]
    max_dp = max(padded_dims)

    orig_shape = x.shape
    x2 = x.reshape(-1, orig_shape[-1]).astype(jnp.float32)
    M = x2.shape[0]

    resident_bytes = (sum(int(w.size) * w.dtype.itemsize for w in w_list)
                      + sum(int(b.size) * b.dtype.itemsize for b in b_list))
    # double-buffered in/out activation tiles + intermediate activation temporaries
    per_row_bytes = 4 * (2 * d0p + 2 * dlp + 2 * max_dp)

    tm = _choose_tm(M, per_row_bytes, resident_bytes)
    mp = _round_up(M, tm)

    # Lane-minimal padding: batch rows to the tile multiple, features only to the
    # first layer's 128-padded width (NOT to the max hidden width).
    if mp == M and d0p == in_dim:
        xp = x2
    else:
        xp = jnp.zeros((mp, d0p), jnp.float32).at[:M, :in_dim].set(x2)

    grid = (mp // tm,)

    flops = 2 * mp * sum(padded_dims[l] * padded_dims[l + 1] for l in range(num_layers))
    transcendentals = (mp * sum(padded_dims[l + 1] for l in range(num_layers - 1))
                       if activation == "Tanh" else 0)
    bytes_accessed = 4 * mp * (d0p + dlp) + resident_bytes

    kernel = functools.partial(
        _mlp_fused_kernel,
        num_layers=num_layers,
        activation=activation,
        out_activation=out_activation,
    )

    in_specs = [pl.BlockSpec((tm, d0p), lambda i: (i, 0))]          # x tile
    in_specs += [_resident_spec(tuple(w.shape)) for w in w_list]    # weights (resident, 1-buf)
    in_specs += [_resident_spec(tuple(b.shape)) for b in b_list]    # biases  (resident, 1-buf)

    cp_kwargs = dict(dimension_semantics=("parallel",))             # shard batch tiles (v7x)
    vmem_est = resident_bytes + tm * per_row_bytes + (1 << 20)
    if vmem_est > 30 * 1024 * 1024:
        # TODO(synk): if resident weights ever exceed ~48 MiB (v7x physical VMEM headroom),
        # stream them layer-by-layer with pltpu.emit_pipeline instead of raising the limit.
        cp_kwargs["vmem_limit_bytes"] = int(min(vmem_est, 100 * 1024 * 1024))

    out_p = pl.pallas_call(
        kernel,
        out_shape=jax.ShapeDtypeStruct((mp, dlp), jnp.float32),
        grid=grid,
        in_specs=in_specs,
        out_specs=pl.BlockSpec((tm, dlp), lambda i: (i, 0)),
        compiler_params=pltpu.CompilerParams(**cp_kwargs),
        cost_estimate=pl.CostEstimate(
            flops=int(flops),
            transcendentals=int(transcendentals),
            bytes_accessed=int(bytes_accessed),
        ),
    )(xp, *w_list, *b_list)

    out = out_p[:M, :out_dim]
    return out.reshape(orig_shape[:-1] + (out_dim,))


class MLP:
    """JAX/Pallas port of the PyTorch MLP (Linear+act per layer, fused kernel).

    dim_list: [in, hidden..., out]; hidden layers use `activation_type`,
    last layer uses `out_activation_type` (default Identity).
    """

    def __init__(self, dim_list, activation_type="Tanh",
                 out_activation_type="Identity", key=None, verbose=False):
        if activation_type not in _SUPPORTED_ACTS:
            raise ValueError(f"unsupported activation: {activation_type}")
        if out_activation_type not in _SUPPORTED_ACTS:
            raise ValueError(f"unsupported activation: {out_activation_type}")
        if key is None:
            key = jax.random.PRNGKey(0)

        self.dim_list = list(dim_list)
        self.activation_type = activation_type
        self.out_activation_type = out_activation_type
        self.padded_dims = [_round_up(d, 128) for d in self.dim_list]

        num_layer = len(dim_list) - 1
        self.params = []  # (w (out,in), b (out,)) — PyTorch layout, for reference use
        for idx in range(num_layer):
            i_dim, o_dim = dim_list[idx], dim_list[idx + 1]
            key, kw, kb = jax.random.split(key, 3)
            # nn.Linear default init: U(-1/sqrt(in), 1/sqrt(in))
            bound = 1.0 / float(i_dim) ** 0.5
            w = jax.random.uniform(kw, (o_dim, i_dim), jnp.float32, -bound, bound)
            b = jax.random.uniform(kb, (o_dim,), jnp.float32, -bound, bound)
            self.params.append((w, b))

        # Pre-transpose + per-layer zero-pad ONCE.  Weights stored in bf16 (MXU-native,
        # halves resident VMEM/HBM bytes); biases stay f32 (negligible bytes, keeps the
        # VPU bias/tanh path pure f32 — no extra converts on v5e).
        self.w_pad, self.b_pad = [], []
        for idx, (w, b) in enumerate(self.params):
            i_dim, o_dim = self.dim_list[idx], self.dim_list[idx + 1]
            ip, op = self.padded_dims[idx], self.padded_dims[idx + 1]
            wp = (jnp.zeros((ip, op), jnp.float32)
                  .at[:i_dim, :o_dim].set(w.T)
                  .astype(jnp.bfloat16))
            bp = jnp.zeros((1, op), jnp.float32).at[0, :o_dim].set(b)
            self.w_pad.append(wp)
            self.b_pad.append(bp)

        self._forward = jax.jit(functools.partial(
            _mlp_pallas_forward,
            activation=self.activation_type,
            out_activation=self.out_activation_type,
            dims=tuple(self.dim_list),
            padded_dims=tuple(self.padded_dims),
        ))

        if verbose:
            print(self.dim_list, self.padded_dims)

    def __call__(self, x):
        return self._forward(x, *self.w_pad, *self.b_pad)


def _reference_forward(x, params, activation, out_activation):
    h = x
    n = len(params)
    for idx, (w, b) in enumerate(params):
        h = h @ w.T + b
        act = out_activation if idx == n - 1 else activation
        if act == "Tanh":
            h = jnp.tanh(h)
        elif act == "ReLU":
            h = jnp.maximum(h, 0.0)
    return h


if __name__ == "__main__":
    key = jax.random.PRNGKey(0)
    key, xkey, pkey = jax.random.split(key, 3)

    # small shapes consistent with an actor/critic MLP: batch=2, dims [4,32,32,3]
    dim_list = [4, 32, 32, 3]
    batch = 2
    x = jax.random.normal(xkey, (batch, dim_list[0]), jnp.float32)

    mlp = MLP(dim_list, activation_type="Tanh",
              out_activation_type="Identity", key=pkey)

    out = jax.block_until_ready(mlp(x))
    assert out.shape == (batch, dim_list[-1])

    # Reference in plain JAX f32 (PyTorch-layout weights).  The kernel feeds bf16
    # operands to the MXU (f32 accumulate), so the tolerance is loosened vs 1e-5.
    ref = _reference_forward(x, mlp.params, "Tanh", "Identity")
    assert jnp.allclose(out, ref, atol=2e-2, rtol=2e-2), float(jnp.max(jnp.abs(out - ref)))

    # larger batch to exercise grid>1 / "parallel" / tile-selection path
    key, xkey2 = jax.random.split(key)
    x_big = jax.random.normal(xkey2, (300, dim_list[0]), jnp.float32)
    out_big = jax.block_until_ready(mlp(x_big))
    ref_big = _reference_forward(x_big, mlp.params, "Tanh", "Identity")
    assert out_big.shape == (300, dim_list[-1])
    assert jnp.allclose(out_big, ref_big, atol=2e-2, rtol=2e-2)

    print("KERNEL_OK")
</pallas_src>

<mosaic_0001>
module attributes {stable_mosaic.version = 11 : i64} {
  func.func @_mlp_fused_kernel(%arg0: i32, %arg1: memref<8x128xf32, #tpu.memory_space<vmem>>, %arg2: memref<128x128xbf16, #tpu.memory_space<vmem>>, %arg3: memref<128x128xbf16, #tpu.memory_space<vmem>>, %arg4: memref<128x128xbf16, #tpu.memory_space<vmem>>, %arg5: memref<1x128xf32, #tpu.memory_space<vmem>>, %arg6: memref<1x128xf32, #tpu.memory_space<vmem>>, %arg7: memref<1x128xf32, #tpu.memory_space<vmem>>, %arg8: memref<8x128xf32, #tpu.memory_space<vmem>>) attributes {dimension_semantics = [#tpu.dimension_semantics<parallel>], iteration_bounds = array<i64: 1>, scalar_prefetch = 0 : i64, scratch_operands = 0 : i64, tpu.core_type = #tpu.core_type<tc>, window_params = [{transform_indices = @transform_0, window_bounds = array<i64: 8, 128>}, {pipeline_mode = #tpu.pipeline_mode<synchronous>, transform_indices = @transform_1, window_bounds = array<i64: 128, 128>}, {pipeline_mode = #tpu.pipeline_mode<synchronous>, transform_indices = @transform_2, window_bounds = array<i64: 128, 128>}, {pipeline_mode = #tpu.pipeline_mode<synchronous>, transform_indices = @transform_3, window_bounds = array<i64: 128, 128>}, {pipeline_mode = #tpu.pipeline_mode<synchronous>, transform_indices = @transform_4, window_bounds = array<i64: 1, 128>}, {pipeline_mode = #tpu.pipeline_mode<synchronous>, transform_indices = @transform_5, window_bounds = array<i64: 1, 128>}, {pipeline_mode = #tpu.pipeline_mode<synchronous>, transform_indices = @transform_6, window_bounds = array<i64: 1, 128>}, {transform_indices = @transform_7, window_bounds = array<i64: 8, 128>}]} {
    %c0 = arith.constant 0 : index
    %c0_0 = arith.constant 0 : index
    %0 = vector.load %arg1[%c0, %c0_0] : memref<8x128xf32, #tpu.memory_space<vmem>>, vector<8x128xf32>
    %1 = arith.truncf %0 : vector<8x128xf32> to vector<8x128xbf16>
    %c0_1 = arith.constant 0 : index
    %c0_2 = arith.constant 0 : index
    %2 = vector.load %arg2[%c0_1, %c0_2] : memref<128x128xbf16, #tpu.memory_space<vmem>>, vector<128x128xbf16>
    %cst = arith.constant dense<0.000000e+00> : vector<8x128xf32>
    %3 = tpu.matmul %1, %2, %cst {dimension_numbers = #tpu.dot_dimension_numbers<[1], [0], [0], [1], [0, 0, 1, 1], [], []>} : vector<8x128xbf16>, vector<128x128xbf16>, vector<8x128xf32> -> vector<8x128xf32>
    %c0_3 = arith.constant 0 : index
    %c0_4 = arith.constant 0 : index
    %4 = vector.load %arg5[%c0_3, %c0_4] : memref<1x128xf32, #tpu.memory_space<vmem>>, vector<1x128xf32>
    %5 = vector.broadcast %4 : vector<1x128xf32> to vector<8x128xf32>
    %6 = arith.addf %3, %5 : vector<8x128xf32>
    %7 = math.tanh %6 : vector<8x128xf32>
    %8 = arith.truncf %7 : vector<8x128xf32> to vector<8x128xbf16>
    %c0_5 = arith.constant 0 : index
    %c0_6 = arith.constant 0 : index
    %9 = vector.load %arg3[%c0_5, %c0_6] : memref<128x128xbf16, #tpu.memory_space<vmem>>, vector<128x128xbf16>
    %cst_7 = arith.constant dense<0.000000e+00> : vector<8x128xf32>
    %10 = tpu.matmul %8, %9, %cst_7 {dimension_numbers = #tpu.dot_dimension_numbers<[1], [0], [0], [1], [0, 0, 1, 1], [], []>} : vector<8x128xbf16>, vector<128x128xbf16>, vector<8x128xf32> -> vector<8x128xf32>
    %c0_8 = arith.constant 0 : index
    %c0_9 = arith.constant 0 : index
    %11 = vector.load %arg6[%c0_8, %c0_9] : memref<1x128xf32, #tpu.memory_space<vmem>>, vector<1x128xf32>
    %12 = vector.broadcast %11 : vector<1x128xf32> to vector<8x128xf32>
    %13 = arith.addf %10, %12 : vector<8x128xf32>
    %14 = math.tanh %13 : vector<8x128xf32>
    %15 = arith.truncf %14 : vector<8x128xf32> to vector<8x128xbf16>
    %c0_10 = arith.constant 0 : index
    %c0_11 = arith.constant 0 : index
    %16 = vector.load %arg4[%c0_10, %c0_11] : memref<128x128xbf16, #tpu.memory_space<vmem>>, vector<128x128xbf16>
    %cst_12 = arith.constant dense<0.000000e+00> : vector<8x128xf32>
    %17 = tpu.matmul %15, %16, %cst_12 {dimension_numbers = #tpu.dot_dimension_numbers<[1], [0], [0], [1], [0, 0, 1, 1], [], []>} : vector<8x128xbf16>, vector<128x128xbf16>, vector<8x128xf32> -> vector<8x128xf32>
    %c0_13 = arith.constant 0 : index
    %c0_14 = arith.constant 0 : index
    %18 = vector.load %arg7[%c0_13, %c0_14] : memref<1x128xf32, #tpu.memory_space<vmem>>, vector<1x128xf32>
    %19 = vector.broadcast %18 : vector<1x128xf32> to vector<8x128xf32>
    %20 = arith.addf %17, %19 : vector<8x128xf32>
    %c0_15 = arith.constant 0 : index
    %c0_16 = arith.constant 0 : index
    %21 = vector.load %arg8[%c0_15, %c0_16] : memref<8x128xf32, #tpu.memory_space<vmem>>, vector<8x128xf32>
    tpu.vector_store %arg8[%c0_15, %c0_16], %20 {strides = array<i32>} : memref<8x128xf32, #tpu.memory_space<vmem>>, vector<8x128xf32>,
    return
  }
  func.func @transform_0(%arg0: i32) -> (i32, i32) {
    %c0_i32 = arith.constant 0 : i32
    %c0_i32_0 = arith.constant 0 : i32
    return %arg0, %c0_i32 : i32, i32
  }
  func.func @transform_1(%arg0: i32) -> (i32, i32) {
    %c0_i32 = arith.constant 0 : i32
    %c0_i32_0 = arith.constant 0 : i32
    %c0_i32_1 = arith.constant 0 : i32
    return %c0_i32, %c0_i32_0 : i32, i32
  }
  func.func @transform_2(%arg0: i32) -> (i32, i32) {
    %c0_i32 = arith.constant 0 : i32
    %c0_i32_0 = arith.constant 0 : i32
    %c0_i32_1 = arith.constant 0 : i32
    return %c0_i32, %c0_i32_0 : i32, i32
  }
  func.func @transform_3(%arg0: i32) -> (i32, i32) {
    %c0_i32 = arith.constant 0 : i32
    %c0_i32_0 = arith.constant 0 : i32
    %c0_i32_1 = arith.constant 0 : i32
    return %c0_i32, %c0_i32_0 : i32, i32
  }
  func.func @transform_4(%arg0: i32) -> (i32, i32) {
    %c0_i32 = arith.constant 0 : i32
    %c0_i32_0 = arith.constant 0 : i32
    %c0_i32_1 = arith.constant 0 : i32
    return %c0_i32, %c0_i32_0 : i32, i32
  }
  func.func @transform_5(%arg0: i32) -> (i32, i32) {
    %c0_i32 = arith.constant 0 : i32
    %c0_i32_0 = arith.constant 0 : i32
    %c0_i32_1 = arith.constant 0 : i32
    return %c0_i32, %c0_i32_0 : i32, i32
  }
  func.func @transform_6(%arg0: i32) -> (i32, i32) {
    %c0_i32 = arith.constant 0 : i32
    %c0_i32_0 = arith.constant 0 : i32
    %c0_i32_1 = arith.constant 0 : i32
    return %c0_i32, %c0_i32_0 : i32, i32
  }
  func.func @transform_7(%arg0: i32) -> (i32, i32) {
    %c0_i32 = arith.constant 0 : i32
    %c0_i32_0 = arith.constant 0 : i32
    return %arg0, %c0_i32 : i32, i32
  }
}

</mosaic_0001>

<bundles_post_ra>
// kernel: _mlp_pallas_forward.1
= control target key start
LH: loop header
LB: loop body
LE: loop exit
PB: predicated region body
PF: predicated region fallthrough
CT: control target
= control target key end

     0   :  { %12 = vsyncpa [#allocation3], 0  ;;  %s606_s0 = inlined_call_operand.vmem [shape: f32[8,128], index: 0, kind: input, shape index: {}]   ;;  %s607_s1 = inlined_call_operand.hbm [shape: bf16[128,128], index: 1, kind: input, shape index: {}]   ;;  %s608_s2 = inlined_call_operand.hbm [shape: bf16[128,128], index: 2, kind: input, shape index: {}]   ;;  %s609_s3 = inlined_call_operand.hbm [shape: bf16[128,128], index: 3, kind: input, shape index: {}]   ;;  %s610_s4 = inlined_call_operand.vmem [shape: f32[1,128], index: 4, kind: input, shape index: {}]   ;;  %s611_s5 = inlined_call_operand.vmem [shape: f32[1,128], index: 5, kind: input, shape index: {}]   ;;  %s612_s6 = inlined_call_operand.vmem [shape: f32[1,128], index: 6, kind: input, shape index: {}]   ;;  %s613_s7 = inlined_call_operand.vmem [shape: f32[8,128], index: 7, kind: output, shape index: {}]  }
   0x1   :  { %13 = vsyncpa [#allocation5], 0  ;;  %s33_s26 = sshll.u32 %s608_s2, 4  ;;  %s537_s27 = smov [#allocation4]   ;;  %s34_s26 = int_to_ptr.hbm [resolvable:$true] %s33_s26 }
   0x2   :  { %s35_s28 = sshll.u32 %s537_s27, 4  ;;  %s20_s8 = sshll.u32 %s607_s1, 4  ;;  %s36_s28 = int_to_ptr.vmem [resolvable:$true] %s35_s28  ;;  %s21_s8 = int_to_ptr.hbm [resolvable:$true] %s20_s8 }
   0x3   :  { %s538_s9 = smov 64   ;;  %s539_s10 = smov 4  }
   0x4   :  { %41 = dma.hbm_to_vmem [thread:$0]  %s34_s26, 1024, %s36_s28, [#allocation5], %s538_s9, %s538_s9, %s539_s10  }
   0x5   :  { %s540_s11 = smov [#allocation2]   ;;  %s46_s15 = sshll.u32 %s609_s3, 4  ;;  %s47_s15 = int_to_ptr.hbm [resolvable:$true] %s46_s15 }
   0x6   :  { %s22_s12 = sshll.u32 %s540_s11, 4  ;;  %s541_s2 = smov [#allocation6]   ;;  %s23_s12 = int_to_ptr.vmem [resolvable:$true] %s22_s12 }
   0x7   :  { %28 = dma.hbm_to_vmem [thread:$0]  %s21_s8, 1024, %s23_s12, [#allocation3], %s538_s9, %s538_s9, %s539_s10  }
   0x8   :  { %s48_s16 = sshll.u32 %s541_s2, 4  ;;  %s49_s16 = int_to_ptr.vmem [resolvable:$true] %s48_s16 }
   0x9   :  { %54 = dma.hbm_to_vmem [thread:$0]  %s47_s15, 1024, %s49_s16, [#allocation5], %s538_s9, %s538_s9, %s539_s10  }
   0xa   :  { %533 = dma.done.wait [#allocation3], 1024  }
   0xb   :  { %534 = vsyncadd [#allocation3], 4294966272 }
   0xc   :  { %535 = dma.done.wait [#allocation5], 2048  }
   0xd   :  { %536 = vsyncadd [#allocation5], 4294965248  ;;  %v432_v0 = vld [vmem:[#allocation2 + $0x38] sm:$0xff]  ;;  %v431_v1 = vld [vmem:[#allocation2 + $0x30] sm:$0xff] }
   0xe   :  { %143 = vmatpush.bf16.msra.mxu0 %v432_v0  ;;  %v440_v2 = vld [vmem:[#allocation4 + $0x38] sm:$0xff]  ;;  %v439_v3 = vld [vmem:[#allocation4 + $0x30] sm:$0xff]  ;;  %v430_v4 = vld [vmem:[#allocation2 + $0x28] sm:$0xff] }
   0xf   :  { %226 = vmatpush.bf16.msra.mxu1 %v440_v2  ;;  %v438_v5 = vld [vmem:[#allocation4 + $0x28] sm:$0xff]  ;;  %v429_v6 = vld [vmem:[#allocation2 + $0x20] sm:$0xff]  ;;  %v428_v8 = vld [vmem:[#allocation2 + $0x18] sm:$0xff] }
  0x10   :  { %v437_v7 = vld [vmem:[#allocation4 + $0x20] sm:$0xff]  ;;  %v436_v9 = vld [vmem:[#allocation4 + $0x18] sm:$0xff]  ;;  %v427_v10 = vld [vmem:[#allocation2 + $0x10] sm:$0xff] }
  0x11   :  { %v426_v11 = vld [vmem:[#allocation2 + $0x8] sm:$0xff]  ;;  %v425_v12 = vld [vmem:[#allocation2] sm:$0xff]  ;;  %v435_v15 = vld [vmem:[#allocation4 + $0x10] sm:$0xff] }
  0x12   :  { %144 = vmatpush.bf16.msra.mxu0 %v431_v1  ;;  %v73_v13 = vld [vmem:[%s606_s0] sm:$0xff]  ;;  %v434_v16 = vld [vmem:[#allocation4 + $0x8] sm:$0xff]  ;;  %v448_v18 = vld [vmem:[#allocation6 + $0x38] sm:$0xff] }
  0x13   :  { %227 = vmatpush.bf16.msra.mxu1 %v439_v3  ;;  %v74_v14 = vpack.c.bf16 %v73_v13, %v73_v13  ;;  %v433_v17 = vld [vmem:[#allocation4] sm:$0xff]  ;;  %309 = vmatpush.bf16.msra.mxu2 %v448_v18  ;;  %v447_v19 = vld [vmem:[#allocation6 + $0x30] sm:$0xff]  ;;  %v446_v20 = vld [vmem:[#allocation6 + $0x28] sm:$0xff] }
  0x14   :  { %v445_v21 = vld [vmem:[#allocation6 + $0x20] sm:$0xff]  ;;  %v444_v22 = vld [vmem:[#allocation6 + $0x18] sm:$0xff]  ;;  %v443_v29 = vld [vmem:[#allocation6 + $0x10] sm:$0xff] }
  0x15   :  { %v454_v23 = vld [vmem:[%s610_s4] ss:$0 sm:$0xff]  ;;  %v442_v30 = vld [vmem:[#allocation6 + $0x8] sm:$0xff] }
  0x16   :  { %145 = vmatpush.bf16.msra.mxu0 %v430_v4  ;;  %v441_v31 = vld [vmem:[#allocation6] sm:$0xff] }
  0x17   :  { %228 = vmatpush.bf16.msra.mxu1 %v438_v5  ;;  %310 = vmatpush.bf16.msra.mxu2 %v447_v19  ;;  %v455_v32 = vld [vmem:[%s611_s5] ss:$0 sm:$0xff] }
  0x18   :  { %v456_v38 = vld [vmem:[%s612_s6] ss:$0 sm:$0xff] }
  0x1a   :  { %146 = vmatpush.bf16.msra.mxu0 %v429_v6 }
  0x1b   :  { %229 = vmatpush.bf16.msra.mxu1 %v437_v7  ;;  %311 = vmatpush.bf16.msra.mxu2 %v446_v20 }
  0x1e   :  { %147 = vmatpush.bf16.msra.mxu0 %v428_v8 }
  0x1f   :  { %230 = vmatpush.bf16.msra.mxu1 %v436_v9  ;;  %312 = vmatpush.bf16.msra.mxu2 %v445_v21 }
  0x22   :  { %148 = vmatpush.bf16.msra.mxu0 %v427_v10 }
  0x23   :  { %231 = vmatpush.bf16.msra.mxu1 %v435_v15  ;;  %313 = vmatpush.bf16.msra.mxu2 %v444_v22 }
  0x26   :  { %149 = vmatpush.bf16.msra.mxu0 %v426_v11 }
  0x27   :  { %232 = vmatpush.bf16.msra.mxu1 %v434_v16  ;;  %314 = vmatpush.bf16.msra.mxu2 %v443_v29 }
  0x2a   :  { %150 = vmatpush.bf16.msra.mxu0 %v425_v12 }
  0x2b   :  { %233 = vmatpush.bf16.msra.mxu1 %v433_v17  ;;  %315 = vmatpush.bf16.msra.mxu2 %v442_v30 }
  0x2d   :  { %151 = vmatmul.bf16.vlgmr.msra.gmra.mxu0 %v74_v14 }
  0x2f   :  { %316 = vmatpush.bf16.msra.mxu2 %v441_v31 }
  0xaa   :  { %v152_v24 = vpop.f32.mrf.mxu0 }
  0xab   :  { %v153_v25 = vadd.f32 %v454_v23, %v152_v24 }
  0xad   :  { %457 = vtanh.f32 %v153_v25 }
  0xb2   :  { %v154_v26 = vpop.f32.mrf.mxu0 }
  0xb3   :  { %v458_v27 = vpop.eup %457 }
  0xb4   :  { %v157_v28 = vpack.c.bf16 %v458_v27, %v458_v27 }
  0xb6   :  { %234 = vmatmul.bf16.vlgmr.msra.gmra.mxu1 %v157_v28 }
 0x133   :  { %v235_v33 = vpop.f32.mrf.mxu1 }
 0x134   :  { %v236_v34 = vadd.f32 %v455_v32, %v235_v33 }
 0x136   :  { %459 = vtanh.f32 %v236_v34 }
 0x13b   :  { %v237_v35 = vpop.f32.mrf.mxu1 }
 0x13c   :  { %v460_v36 = vpop.eup %459 }
 0x13d   :  { %v240_v37 = vpack.c.bf16 %v460_v36, %v460_v36 }
 0x13f   :  { %317 = vmatmul.bf16.vlgmr.msra.gmra.mxu2 %v240_v37 }
 0x1c2   :  { %v318_v39 = vpop.f32.mrf.mxu2 }
 0x1c3   :  { %v319_v40 = vadd.f32 %v456_v38, %v318_v39 }
 0x1c5   :  { %322 = vst [vmem:[%s613_s7] sm:$0xff] %v319_v40 }
 0x1ca   :  { %v320_v41 = vpop.f32.mrf.mxu2 }
 0x1cb   :  { %327 = vsyncpa [#allocation3], 1 }
 0x1cc   :  { %328 = vsyncpa [#allocation5], 1 }

</bundles_post_ra>
